<compile_context>
chip_gen: v6e
topology: v6e:2x2x1
jax: 0.10.0
libtpu: 0.0.40
codegen_flags: <defaults>
</compile_context>

<pallas_src>
import functools

import jax
import jax.numpy as jnp
from jax.experimental import pallas as pl
from jax.experimental.pallas import tpu as pltpu


def _hybrid_kernel(
    action_dim, state_pad, h, out_w,     # python ints, bound via functools.partial
    x_ref,                               # [B_pad, state_pad]        f32 (lane-dense, zero-padded)
    w1_ref,                              # [h, 2h]                   bf16  (policy1 | value1)
    slab_ref,                            # [state_pad + 3h, h]       bf16  = [wf_pad; w2_bd; w3_bd]
    bias_ref,                            # [8, 2h]                   f32   rows 0..3 = bf|b1|b2|b3
    out_ref,                             # [B_pad, out_w]            f32   = [actions | value | 0-pad]
):
    # static slices into the weight slab / bias buffer (zero runtime cost)
    wf = slab_ref[0:state_pad, :]                          # [state_pad, h]
    w2 = slab_ref[state_pad:state_pad + 2 * h, :]          # [2h, h]   block-diagonal
    w3 = slab_ref[state_pad + 2 * h:state_pad + 3 * h, :]  # [h, out_w] block-diagonal, padded

    bf = bias_ref[0:1, 0:h]
    b1 = bias_ref[1:2, 0:2 * h]
    b2 = bias_ref[2:3, 0:h]
    b3 = bias_ref[3:4, 0:out_w]

    # feature fusion + ReLU (f32 accumulate, bf16 MXU inputs)
    x = x_ref[...].astype(jnp.bfloat16)
    fused = jnp.maximum(jnp.dot(x, wf, preferred_element_type=jnp.float32) + bf, 0.0)

    # fused policy+value layer 1  (N=256: one full MXU pass on v6e/v7x)
    h1 = jnp.maximum(
        jnp.dot(fused.astype(jnp.bfloat16), w1_ref[...],
                preferred_element_type=jnp.float32) + b1, 0.0)

    # fused layer 2 (block-diagonal weights keep the heads independent)
    h2 = jnp.maximum(
        jnp.dot(h1.astype(jnp.bfloat16), w2,
                preferred_element_type=jnp.float32) + b2, 0.0)

    # fused layer 3 -> merged lane-dense output; tanh only on action lanes
    z = jnp.dot(h2.astype(jnp.bfloat16), w3,
                preferred_element_type=jnp.float32) + b3
    col = jax.lax.broadcasted_iota(jnp.int32, z.shape, 1)
    out_ref[...] = jnp.where(col < action_dim, jnp.tanh(z), z)


def prep_params(raw, *, state_dim, action_dim, hidden_dim):
    """One-time packing: live fusion rows, fused heads, one bf16 weight slab, one f32 bias buffer."""
    h, h2 = hidden_dim, hidden_dim // 2
    assert h % 128 == 0 and action_dim + 1 <= h, "packing assumes 128-lane hidden and small action_dim"
    state_pad = ((state_dim + 127) // 128) * 128            # lane-dense K for the first matmul
    out_w = h                                               # merged [actions | value | pad] width

    # fusion weight: keep only rows hit by the state (zero CNN+LSTM half dropped), pad K rows with 0
    wf = jnp.zeros((state_pad, h), jnp.float32).at[:state_dim, :].set(raw["wf"][:state_dim, :])

    # layer-1: horizontally fused heads [h, 2h]
    w1 = jnp.concatenate([raw["wp1"], raw["wv1"]], axis=1)

    # layer-2: block-diagonal [2h, h]
    w2 = jnp.zeros((2 * h, 2 * h2), jnp.float32)
    w2 = w2.at[:h, :h2].set(raw["wp2"]).at[h:, h2:].set(raw["wv2"])

    # layer-3: block-diagonal, zero-padded to out_w lanes [h, out_w]
    w3 = jnp.zeros((2 * h2, out_w), jnp.float32)
    w3 = w3.at[:h2, :action_dim].set(raw["wp3"])
    w3 = w3.at[h2:, action_dim:action_dim + 1].set(raw["wv3"])

    # single contiguous bf16 weight slab for all 128-lane weights (1 DMA instead of 3)
    slab = jnp.concatenate([wf, w2, w3], axis=0).astype(jnp.bfloat16)   # [state_pad + 3h, h]

    # single f32 bias buffer (1 DMA instead of 4): rows 0..3 = bf | b1 | b2 | b3
    bias = jnp.zeros((8, 2 * h), jnp.float32)
    bias = bias.at[0, :h].set(raw["bf"][0])
    bias = bias.at[1, :h].set(raw["bp1"][0]).at[1, h:2 * h].set(raw["bv1"][0])
    bias = bias.at[2, :h2].set(raw["bp2"][0]).at[2, h2:h].set(raw["bv2"][0])
    bias = bias.at[3, :action_dim].set(raw["bp3"][0])
    bias = bias.at[3, action_dim:action_dim + 1].set(raw["bv3"][0])

    return {
        "slab": slab,
        "w1": w1.astype(jnp.bfloat16),
        "bias": bias,
        "state_pad": state_pad,
        "action_dim": action_dim,
        "hidden_dim": h,
        "out_w": out_w,
    }


def hybrid_agent_forward(state, packed):
    """state: [B, state_dim] float32. Returns (actions [B, action_dim], value [B, 1])."""
    B, state_dim = state.shape
    action_dim = packed["action_dim"]
    h = packed["hidden_dim"]
    out_w = packed["out_w"]
    state_pad = packed["state_pad"]

    # Pad batch to a multiple of 16 (bf16 (16,128) vreg tile) and lanes to state_pad (=128).
    b_pad = ((B + 15) // 16) * 16
    x = jnp.zeros((b_pad, state_pad), jnp.float32).at[:B, :state_dim].set(state)

    inputs = (x, packed["w1"], packed["slab"], packed["bias"])

    def full_spec(a):
        # block == full array shape (single invocation, no grid, no tiling)
        return pl.BlockSpec(a.shape, lambda: (0,) * a.ndim)

    flops = 2 * b_pad * (state_pad * h + h * 2 * h + 2 * h * h + h * out_w)
    bytes_accessed = sum(a.size * a.dtype.itemsize for a in inputs) + b_pad * out_w * 4

    merged = pl.pallas_call(
        functools.partial(_hybrid_kernel, action_dim, state_pad, h, out_w),
        out_shape=jax.ShapeDtypeStruct((b_pad, out_w), jnp.float32),
        in_specs=[full_spec(a) for a in inputs],
        out_specs=pl.BlockSpec((b_pad, out_w), lambda: (0, 0)),
        cost_estimate=pl.CostEstimate(
            flops=flops,
            transcendentals=b_pad * out_w,
            bytes_accessed=bytes_accessed,
        ),
        compiler_params=pltpu.CompilerParams(vmem_limit_bytes=4 << 20),
    )(*inputs)

    actions = merged[:B, :action_dim]
    value = merged[:B, action_dim:action_dim + 1]
    return actions, value


def init_params(key, state_dim, action_dim, hidden_dim):
    """Synthetic f32 parameters in PyTorch layout semantics (stored as [in, out]; biases [1, out])."""
    dims = {
        "wf":  (state_dim + hidden_dim, hidden_dim),
        "wp1": (hidden_dim, hidden_dim),
        "wp2": (hidden_dim, hidden_dim // 2),
        "wp3": (hidden_dim // 2, action_dim),
        "wv1": (hidden_dim, hidden_dim),
        "wv2": (hidden_dim, hidden_dim // 2),
        "wv3": (hidden_dim // 2, 1),
    }
    params = {}
    keys = jax.random.split(key, len(dims))
    for k, (name, shape) in zip(keys, dims.items()):
        scale = 1.0 / jnp.sqrt(shape[0])
        params[name] = jax.random.uniform(k, shape, jnp.float32, -scale, scale)
        params[name.replace("w", "b")] = jnp.zeros((1, shape[1]), jnp.float32) + 0.01
    return params


if __name__ == "__main__":
    B = 2
    STATE_DIM = 50
    ACTION_DIM = 3
    HIDDEN_DIM = 128

    key = jax.random.PRNGKey(0)
    k_state, k_params = jax.random.split(key)
    state = jax.random.normal(k_state, (B, STATE_DIM), jnp.float32)
    raw = init_params(k_params, STATE_DIM, ACTION_DIM, HIDDEN_DIM)
    packed = prep_params(raw, state_dim=STATE_DIM, action_dim=ACTION_DIM, hidden_dim=HIDDEN_DIM)

    actions, value = hybrid_agent_forward(state, packed)
    jax.block_until_ready((actions, value))
    assert actions.shape == (B, ACTION_DIM) and value.shape == (B, 1)

    # --- Reference 1: same packed bf16-weight math in plain JAX (tight regression gate) ---
    H = HIDDEN_DIM
    SP = packed["state_pad"]
    slab = packed["slab"]
    bias = packed["bias"]
    bf_ = bias[0:1, :H]
    b1_ = bias[1:2, :2 * H]
    b2_ = bias[2:3, :H]
    b3_ = bias[3:4, :packed["out_w"]]
    xp = jnp.zeros((B, SP), jnp.float32).at[:, :STATE_DIM].set(state)
    fused = jnp.maximum(jnp.dot(xp.astype(jnp.bfloat16), slab[:SP],
                                preferred_element_type=jnp.float32) + bf_, 0.0)
    h1 = jnp.maximum(jnp.dot(fused.astype(jnp.bfloat16), packed["w1"],
                             preferred_element_type=jnp.float32) + b1_, 0.0)
    h2 = jnp.maximum(jnp.dot(h1.astype(jnp.bfloat16), slab[SP:SP + 2 * H],
                             preferred_element_type=jnp.float32) + b2_, 0.0)
    z = jnp.dot(h2.astype(jnp.bfloat16), slab[SP + 2 * H:SP + 3 * H],
                preferred_element_type=jnp.float32) + b3_
    ref_actions_bf16 = jnp.tanh(z[:, :ACTION_DIM])
    ref_value_bf16 = z[:, ACTION_DIM:ACTION_DIM + 1]
    assert jnp.allclose(actions, ref_actions_bf16, atol=1e-3), "actions mismatch vs bf16 ref"
    assert jnp.allclose(value, ref_value_bf16, atol=1e-3), "value mismatch vs bf16 ref"

    # --- Reference 2: original f32 module semantics (zero CNN-LSTM features branch) ---
    combined = jnp.concatenate([state, jnp.zeros((B, HIDDEN_DIM), jnp.float32)], axis=1)
    fused_f = jax.nn.relu(combined @ raw["wf"] + raw["bf"])
    p = jax.nn.relu(fused_f @ raw["wp1"] + raw["bp1"])
    p = jax.nn.relu(p @ raw["wp2"] + raw["bp2"])
    ref_actions = jnp.tanh(p @ raw["wp3"] + raw["bp3"])
    v = jax.nn.relu(fused_f @ raw["wv1"] + raw["bv1"])
    v = jax.nn.relu(v @ raw["wv2"] + raw["bv2"])
    ref_value = v @ raw["wv3"] + raw["bv3"]
    assert jnp.allclose(actions, ref_actions, atol=5e-2), "actions drifted from f32 reference"
    assert jnp.allclose(value, ref_value, atol=5e-2), "value drifted from f32 reference"

    print("KERNEL_OK")
</pallas_src>

<mosaic_0001>
module attributes {stable_mosaic.version = 11 : i64} {
  func.func @_hybrid_kernel(%arg0: memref<16x128xf32, #tpu.memory_space<vmem>>, %arg1: memref<128x256xbf16, #tpu.memory_space<vmem>>, %arg2: memref<512x128xbf16, #tpu.memory_space<vmem>>, %arg3: memref<8x256xf32, #tpu.memory_space<vmem>>, %arg4: memref<16x128xf32, #tpu.memory_space<vmem>>) attributes {dimension_semantics = [], scalar_prefetch = 0 : i64, scratch_operands = 0 : i64, tpu.core_type = #tpu.core_type<tc>} {
    %c0 = arith.constant 0 : index
    %c0_0 = arith.constant 0 : index
    %0 = vector.load %arg2[%c0, %c0_0] : memref<512x128xbf16, #tpu.memory_space<vmem>>, vector<128x128xbf16>
    %c128 = arith.constant 128 : index
    %c0_1 = arith.constant 0 : index
    %1 = vector.load %arg2[%c128, %c0_1] : memref<512x128xbf16, #tpu.memory_space<vmem>>, vector<256x128xbf16>
    %c384 = arith.constant 384 : index
    %c0_2 = arith.constant 0 : index
    %2 = vector.load %arg2[%c384, %c0_2] : memref<512x128xbf16, #tpu.memory_space<vmem>>, vector<128x128xbf16>
    %c0_3 = arith.constant 0 : index
    %c0_4 = arith.constant 0 : index
    %3 = vector.load %arg3[%c0_3, %c0_4] : memref<8x256xf32, #tpu.memory_space<vmem>>, vector<1x128xf32>
    %c1 = arith.constant 1 : index
    %c0_5 = arith.constant 0 : index
    %4 = vector.load %arg3[%c1, %c0_5] : memref<8x256xf32, #tpu.memory_space<vmem>>, vector<1x256xf32>
    %c2 = arith.constant 2 : index
    %c0_6 = arith.constant 0 : index
    %5 = vector.load %arg3[%c2, %c0_6] : memref<8x256xf32, #tpu.memory_space<vmem>>, vector<1x128xf32>
    %c3 = arith.constant 3 : index
    %c0_7 = arith.constant 0 : index
    %6 = vector.load %arg3[%c3, %c0_7] : memref<8x256xf32, #tpu.memory_space<vmem>>, vector<1x128xf32>
    %c0_8 = arith.constant 0 : index
    %c0_9 = arith.constant 0 : index
    %7 = vector.load %arg0[%c0_8, %c0_9] : memref<16x128xf32, #tpu.memory_space<vmem>>, vector<16x128xf32>
    %8 = arith.truncf %7 : vector<16x128xf32> to vector<16x128xbf16>
    %cst = arith.constant dense<0.000000e+00> : vector<16x128xf32>
    %9 = tpu.matmul %8, %0, %cst {dimension_numbers = #tpu.dot_dimension_numbers<[1], [0], [0], [1], [0, 0, 1, 1], [], []>} : vector<16x128xbf16>, vector<128x128xbf16>, vector<16x128xf32> -> vector<16x128xf32>
    %10 = vector.broadcast %3 : vector<1x128xf32> to vector<16x128xf32>
    %11 = arith.addf %9, %10 : vector<16x128xf32>
    %cst_10 = arith.constant 0.000000e+00 : f32
    %12 = vector.broadcast %cst_10 : f32 to vector<16x128xf32>
    %13 = arith.maximumf %11, %12 : vector<16x128xf32>
    %14 = arith.truncf %13 : vector<16x128xf32> to vector<16x128xbf16>
    %c0_11 = arith.constant 0 : index
    %c0_12 = arith.constant 0 : index
    %15 = vector.load %arg1[%c0_11, %c0_12] : memref<128x256xbf16, #tpu.memory_space<vmem>>, vector<128x256xbf16>
    %cst_13 = arith.constant dense<0.000000e+00> : vector<16x256xf32>
    %16 = tpu.matmul %14, %15, %cst_13 {dimension_numbers = #tpu.dot_dimension_numbers<[1], [0], [0], [1], [0, 0, 1, 1], [], []>} : vector<16x128xbf16>, vector<128x256xbf16>, vector<16x256xf32> -> vector<16x256xf32>
    %17 = vector.broadcast %4 : vector<1x256xf32> to vector<16x256xf32>
    %18 = arith.addf %16, %17 : vector<16x256xf32>
    %cst_14 = arith.constant 0.000000e+00 : f32
    %19 = vector.broadcast %cst_14 : f32 to vector<16x256xf32>
    %20 = arith.maximumf %18, %19 : vector<16x256xf32>
    %21 = arith.truncf %20 : vector<16x256xf32> to vector<16x256xbf16>
    %cst_15 = arith.constant dense<0.000000e+00> : vector<16x128xf32>
    %22 = tpu.matmul %21, %1, %cst_15 {dimension_numbers = #tpu.dot_dimension_numbers<[1], [0], [0], [1], [0, 0, 1, 1], [], []>} : vector<16x256xbf16>, vector<256x128xbf16>, vector<16x128xf32> -> vector<16x128xf32>
    %23 = vector.broadcast %5 : vector<1x128xf32> to vector<16x128xf32>
    %24 = arith.addf %22, %23 : vector<16x128xf32>
    %cst_16 = arith.constant 0.000000e+00 : f32
    %25 = vector.broadcast %cst_16 : f32 to vector<16x128xf32>
    %26 = arith.maximumf %24, %25 : vector<16x128xf32>
    %27 = arith.truncf %26 : vector<16x128xf32> to vector<16x128xbf16>
    %cst_17 = arith.constant dense<0.000000e+00> : vector<16x128xf32>
    %28 = tpu.matmul %27, %2, %cst_17 {dimension_numbers = #tpu.dot_dimension_numbers<[1], [0], [0], [1], [0, 0, 1, 1], [], []>} : vector<16x128xbf16>, vector<128x128xbf16>, vector<16x128xf32> -> vector<16x128xf32>
    %29 = vector.broadcast %6 : vector<1x128xf32> to vector<16x128xf32>
    %30 = arith.addf %28, %29 : vector<16x128xf32>
    %31 = tpu.iota {dimensions = array<i32: 1>} : vector<16x128xi32>
    %c3_i32 = arith.constant 3 : i32
    %32 = vector.broadcast %c3_i32 : i32 to vector<16x128xi32>
    %33 = arith.cmpi slt, %31, %32 : vector<16x128xi32>
    %34 = math.tanh %30 : vector<16x128xf32>
    %35 = arith.select %33, %34, %30 : vector<16x128xi1>, vector<16x128xf32>
    %c0_18 = arith.constant 0 : index
    %c0_19 = arith.constant 0 : index
    %36 = vector.load %arg4[%c0_18, %c0_19] : memref<16x128xf32, #tpu.memory_space<vmem>>, vector<16x128xf32>
    tpu.vector_store %arg4[%c0_18, %c0_19], %35 {strides = array<i32>} : memref<16x128xf32, #tpu.memory_space<vmem>>, vector<16x128xf32>,
    return
  }
}

</mosaic_0001>

<bundles_post_ra>
// kernel: tpu_custom_call.1
= control target key start
LH: loop header
LB: loop body
LE: loop exit
PB: predicated region body
PF: predicated region fallthrough
CT: control target
= control target key end

     0   :  { %9 = vsyncpa [#allocation3], 0  ;;  %s1038_s0 = inlined_call_operand.hbm [shape: f32[16,128], index: 0, kind: input, shape index: {}]   ;;  %s1039_s1 = inlined_call_operand.hbm [shape: bf16[128,256], index: 1, kind: input, shape index: {}]   ;;  %s1040_s2 = inlined_call_operand.hbm [shape: bf16[512,128], index: 2, kind: input, shape index: {}]   ;;  %s1041_s3 = inlined_call_operand.hbm [shape: f32[8,256], index: 3, kind: input, shape index: {}]   ;;  %s1042_s4 = inlined_call_operand.hbm [shape: f32[16,128], index: 4, kind: output, shape index: {}]  }
   0x1   :  { %10 = vsyncpa [#allocation6], 0 }
   0x2   :  { %11 = vsyncpa [#allocation9], 0 }
   0x3   :  { %12 = vsyncpa [#allocation4], 0  ;;  %s957_s15 = smov [#allocation5]   ;;  %s958_s17 = smov [#allocation2]  }
   0x4   :  { %s30_s16 = sshll.u32 %s957_s15, 4  ;;  %s18_s18 = sshll.u32 %s958_s17, 4  ;;  %s31_s16 = int_to_ptr.vmem [resolvable:$true] %s30_s16  ;;  %s19_s18 = int_to_ptr.vmem [resolvable:$true] %s18_s18 }
   0x5   :  { %s857_s19 = scalar_lea.vmem %s31_s16, 2048  ;;  %p862_p1 = scmp.lt.s32.totalorder %s31_s16, %s31_s16 }
   0x6   :  { %p858_p0 = scmp.ne.s32.totalorder %s31_s16, %s857_s19  ;;  %p863_p2 = scmp.lt.s32.totalorder %s857_s19, %s857_s19 }
   0x8   :  { %p864_p3 = por %p863_p2, %p862_p1 }
   0xa   :  { %p865_p4 = pnand %p864_p3, %p858_p0 }
   0xc   :  { %868 = shalt.err (!%p865_p4)
}
   0xd   :  { %s959_s20 = smov 128   ;;  %s960_s21 = smov 8  }
   0xe   :  { %36 = dma.hbm_to_vmem [thread:$0]  %s1039_s1, 2048, %s31_s16, [#allocation6], %s959_s20, %s959_s20, %s960_s21  }
   0xf   :  { %s877_s24 = scalar_lea.vmem %s19_s18, 256  ;;  %p882_p6 = scmp.lt.s32.totalorder %s19_s18, %s19_s18 }
  0x10   :  { %p878_p5 = scmp.ne.s32.totalorder %s19_s18, %s877_s24  ;;  %p883_p7 = scmp.lt.s32.totalorder %s877_s24, %s877_s24 }
  0x12   :  { %p884_p8 = por %p883_p7, %p882_p6 }
  0x14   :  { %p885_p9 = pnand %p884_p8, %p878_p5 }
  0x16   :  { %888 = shalt.err (!%p885_p9)
}
  0x17   :  { %24 = dma.hbm_to_vmem [thread:$0]  %s1038_s0, 256, %s19_s18, [#allocation3], %s959_s20, %s959_s20, %s960_s21  }
  0x18   :  { %s961_s27 = smov [#allocation7]  }
  0x19   :  { %s42_s28 = sshll.u32 %s961_s27, 4  ;;  %s43_s28 = int_to_ptr.vmem [resolvable:$true] %s42_s28 }
  0x1a   :  { %s897_s29 = scalar_lea.vmem %s43_s28, 4096  ;;  %p902_p11 = scmp.lt.s32.totalorder %s43_s28, %s43_s28 }
  0x1b   :  { %p898_p10 = scmp.ne.s32.totalorder %s43_s28, %s897_s29  ;;  %p903_p12 = scmp.lt.s32.totalorder %s897_s29, %s897_s29 }
  0x1d   :  { %p904_p13 = por %p903_p12, %p902_p11 }
  0x1f   :  { %p905_p0 = pnand %p904_p13, %p898_p10 }
  0x21   :  { %908 = shalt.err (!%p905_p0)
}
  0x22   :  { %s962_s1 = smov 64   ;;  %s963_s30 = smov 4  }
  0x23   :  { %48 = dma.hbm_to_vmem [thread:$0]  %s1040_s2, 4096, %s43_s28, [#allocation6], %s962_s1, %s962_s1, %s963_s30  }
  0x24   :  { %s964_s7 = smov [#allocation8]  }
  0x25   :  { %s55_s8 = sshll.u32 %s964_s7, 4  ;;  %s56_s8 = int_to_ptr.vmem [resolvable:$true] %s55_s8 }
  0x26   :  { %s917_s0 = scalar_lea.vmem %s56_s8, 256  ;;  %p922_p2 = scmp.lt.s32.totalorder %s56_s8, %s56_s8 }
  0x27   :  { %p918_p1 = scmp.ne.s32.totalorder %s56_s8, %s917_s0  ;;  %p923_p3 = scmp.lt.s32.totalorder %s917_s0, %s917_s0 }
  0x29   :  { %p924_p4 = por %p923_p3, %p922_p2 }
  0x2b   :  { %p925_p5 = pnand %p924_p4, %p918_p1 }
  0x2d   :  { %928 = shalt.err (!%p925_p5)
}
  0x2e   :  { %58 = dma.hbm_to_vmem [thread:$0]  %s1041_s3, 256, %s56_s8, [#allocation9]  }
  0x2f   :  { %949 = dma.done.wait [#allocation3], 256  }
  0x30   :  { %950 = vsyncadd [#allocation3], 4294967040 }
  0x31   :  { %951 = dma.done.wait [#allocation6], 6144  }
  0x32   :  { %952 = vsyncadd [#allocation6], 4294961152 }
  0x33   :  { %953 = dma.done.wait [#allocation9], 256  }
  0x34   :  { %954 = vsyncadd [#allocation9], 4294967040  ;;  %v965_v0 = vmov 0.0   ;;  %vm966_vm0 = vmmov 0   ;;  %v789_v1 = vld [vmem:[#allocation7 + $0x38] sm:$0xff]   ;;  %v790_v2 = vld [vmem:[#allocation7 + $0x30] sm:$0xff]   ;;  %v253_v59 = vlaneseq }
  0x35   :  { %737 = vmatprep.subr.bf16.mxu0 %v965_v0  ;;  %753 = vmatprep.mubr.msk.bf16.mxu0 %vm966_vm0, %v965_v0  ;;  %v791_v3 = vld [vmem:[#allocation7 + $0x28] sm:$0xff]   ;;  %v792_v4 = vld [vmem:[#allocation7 + $0x20] sm:$0xff]   ;;  %v797_v5 = vld [vmem:[#allocation5 + $0x74] ss:$8 sps:$4 sm:$0xff]   ;;  %v967_v28 = vmov 0   ;;  %s968_s2 = smov [#allocation10]  }
  0x36   :  { %738 = vmatpush3.bf16.msra.mxu0 %v789_v1  ;;  %v799_v6 = vld [vmem:[#allocation5 + $0x70] ss:$8 sps:$4 sm:$0xff]   ;;  %v800_v7 = vld [vmem:[#allocation5 + $0x64] ss:$8 sps:$4 sm:$0xff]   ;;  %343 = vmatprep.subr.bf16.mxu1 %v797_v5  ;;  %v802_v8 = vld [vmem:[#allocation5 + $0x60] ss:$8 sps:$4 sm:$0xff]  }
  0x37   :  { %739 = vmatprep.subr.bf16.mxu0 %v965_v0  ;;  %344 = vmatpush1.bf16.msra.mxu1 %v799_v6  ;;  %v803_v9 = vld [vmem:[#allocation5 + $0x54] ss:$8 sps:$4 sm:$0xff]   ;;  %v805_v12 = vld [vmem:[#allocation5 + $0x50] ss:$8 sps:$4 sm:$0xff]   ;;  %v806_v13 = vld [vmem:[#allocation5 + $0x44] ss:$8 sps:$4 sm:$0xff]  }
  0x38   :  { %345 = vmatprep.subr.bf16.mxu1 %v800_v7  ;;  %v793_v10 = vld [vmem:[#allocation7 + $0x18] sm:$0xff]   ;;  %v794_v11 = vld [vmem:[#allocation7 + $0x10] sm:$0xff]   ;;  %v808_v14 = vld [vmem:[#allocation5 + $0x40] ss:$8 sps:$4 sm:$0xff]   ;;  %375 = vmatprep.mubr.bf16.mxu1 %v967_v28  ;;  %v254_v60 = vshrl.u32 %v253_v59, 7  ;;  %s635_s3 = sshll.u32 %s968_s2, 4  ;;  %s636_s3 = int_to_ptr.vmem [resolvable:$true] %s635_s3 }
  0x39   :  { %v809_v15 = vld [vmem:[#allocation5 + $0x34] ss:$8 sps:$4 sm:$0xff]   ;;  %v795_v16 = vld [vmem:[#allocation7 + $0x8] sm:$0xff]   ;;  %v811_v17 = vld [vmem:[#allocation5 + $0x30] ss:$8 sps:$4 sm:$0xff]   ;;  %s929_s11 = scalar_lea.vmem %s636_s3, 256  ;;  %p934_p7 = scmp.lt.s32.totalorder %s636_s3, %s636_s3 }
  0x3a   :  { %740 = vmatpush3.bf16.msra.mxu0 %v790_v2  ;;  %v812_v18 = vld [vmem:[#allocation5 + $0x24] ss:$8 sps:$4 sm:$0xff]   ;;  %v141_v20 = vld [vmem:[#allocation2] sm:$0xff]  ;;  %v142_v21 = vld [vmem:[#allocation2 + $0x8] sm:$0xff]  ;;  %v259_v61 = vsub.s32 1, %v254_v60  ;;  %v255_v62 = vsub.s32 0, %v254_v60  ;;  %p930_p6 = scmp.ne.s32.totalorder %s636_s3, %s929_s11  ;;  %p935_p8 = scmp.lt.s32.totalorder %s929_s11, %s929_s11 }
  0x3b   :  { %741 = vmatprep.subr.bf16.mxu0 %v965_v0  ;;  %346 = vmatpush1.bf16.msra.mxu1 %v802_v8  ;;  %v796_v19 = vld [vmem:[#allocation7] sm:$0xff]   ;;  %v143_v22 = vpack.c.bf16 %v142_v21, %v141_v20  ;;  %v815_v24 = vld [vmem:[#allocation5 + $0x14] ss:$8 sps:$4 sm:$0xff]   ;;  %v817_v25 = vld [vmem:[#allocation5 + $0x10] ss:$8 sps:$4 sm:$0xff]  }
  0x3c   :  { %347 = vmatprep.subr.bf16.mxu1 %v803_v9  ;;  %v814_v23 = vld [vmem:[#allocation5 + $0x20] ss:$8 sps:$4 sm:$0xff]   ;;  %v818_v26 = vld [vmem:[#allocation5 + $0x4] ss:$8 sps:$4 sm:$0xff]   ;;  %v821_v29 = vld [vmem:[#allocation7 + $0xb8] sm:$0xff]   ;;  %p936_p9 = por %p935_p8, %p934_p7 }
  0x3d   :  { %v820_v27 = vld [vmem:[#allocation5] ss:$8 sps:$4 sm:$0xff]   ;;  %v822_v30 = vld [vmem:[#allocation7 + $0x78] sm:$0xff]   ;;  %v823_v31 = vld [vmem:[#allocation7 + $0xb0] sm:$0xff]  }
  0x3e   :  { %742 = vmatpush3.bf16.msra.mxu0 %v791_v3  ;;  %v824_v32 = vld [vmem:[#allocation7 + $0x70] sm:$0xff]   ;;  %v825_v33 = vld [vmem:[#allocation7 + $0xa8] sm:$0xff]   ;;  %v827_v35 = vld [vmem:[#allocation7 + $0xa0] sm:$0xff]   ;;  %p937_p10 = pnand %p936_p9, %p930_p6 }
  0x3f   :  { %743 = vmatprep.subr.bf16.mxu0 %v965_v0  ;;  %348 = vmatpush1.bf16.msra.mxu1 %v805_v12  ;;  %v826_v34 = vld [vmem:[#allocation7 + $0x68] sm:$0xff]   ;;  %v828_v36 = vld [vmem:[#allocation7 + $0x60] sm:$0xff]   ;;  %v829_v37 = vld [vmem:[#allocation7 + $0x98] sm:$0xff]  }
  0x40   :  { %349 = vmatprep.subr.bf16.mxu1 %v806_v13  ;;  %v830_v38 = vld [vmem:[#allocation7 + $0x58] sm:$0xff]   ;;  %v136_v39 = vld [vmem:[#allocation8] ss:$0 sm:$0xff]  ;;  %v831_v49 = vld [vmem:[#allocation7 + $0x90] sm:$0xff]  }
  0x41   :  { %v832_v50 = vld [vmem:[#allocation7 + $0x50] sm:$0xff]   ;;  %v833_v51 = vld [vmem:[#allocation7 + $0x88] sm:$0xff]   ;;  %v835_v53 = vld [vmem:[#allocation7 + $0x80] sm:$0xff]  }
  0x42   :  { %744 = vmatpush3.bf16.msra.mxu0 %v792_v4  ;;  %v834_v52 = vld [vmem:[#allocation7 + $0x48] sm:$0xff]   ;;  %v836_v54 = vld [vmem:[#allocation7 + $0x40] sm:$0xff]   ;;  %v837_v55 = vld [vmem:[#allocation7 + $0xf8] sm:$0xff]  }
  0x43   :  { %745 = vmatprep.subr.bf16.mxu0 %v965_v0  ;;  %350 = vmatpush1.bf16.msra.mxu1 %v808_v14  ;;  %v838_v56 = vld [vmem:[#allocation7 + $0xf0] sm:$0xff]   ;;  %v839_v57 = vld [vmem:[#allocation7 + $0xe8] sm:$0xff]   ;;  %v840_v58 = vld [vmem:[#allocation7 + $0xe0] sm:$0xff]  }
  0x44   :  { %351 = vmatprep.subr.bf16.mxu1 %v809_v15  ;;  %v138_v63 = vld [vmem:[#allocation8 + $0x1] ss:$8 sm:$0x3] }
  0x45   :  { %v260_v2 = vrot.slane %v138_v63, %v259_v61  ;;  %v256_v3 = vrot.slane %v138_v63, %v255_v62  ;;  %v844_v20 = vld [vmem:[#allocation7 + $0xc0] sm:$0xff]  }
  0x46   :  { %746 = vmatpush3.bf16.msra.mxu0 %v793_v10 }
  0x47   :  { %747 = vmatprep.subr.bf16.mxu0 %v965_v0  ;;  %352 = vmatpush1.bf16.msra.mxu1 %v811_v17  ;;  %v841_v17 = vld [vmem:[#allocation7 + $0xd8] sm:$0xff]  }
  0x48   :  { %353 = vmatprep.subr.bf16.mxu1 %v812_v18  ;;  %v842_v18 = vld [vmem:[#allocation7 + $0xd0] sm:$0xff]  }
  0x4a   :  { %748 = vmatpush3.bf16.msra.mxu0 %v794_v11 }
  0x4b   :  { %749 = vmatprep.subr.bf16.mxu0 %v965_v0  ;;  %354 = vmatpush1.bf16.msra.mxu1 %v814_v23 }
  0x4c   :  { %355 = vmatprep.subr.bf16.mxu1 %v815_v24  ;;  %v139_v24 = vld [vmem:[#allocation8 + $0x2] ss:$0 sm:$0xff] }
  0x4e   :  { %750 = vmatpush3.bf16.msra.mxu0 %v795_v16 }
  0x4f   :  { %751 = vmatprep.subr.bf16.mxu0 %v965_v0  ;;  %356 = vmatpush1.bf16.msra.mxu1 %v817_v25 }
  0x50   :  { %357 = vmatprep.subr.bf16.mxu1 %v818_v26 }
  0x52   :  { %752 = vmatpush3.bf16.msra.mxu0 %v796_v19  ;;  %v843_v19 = vld [vmem:[#allocation7 + $0xc8] sm:$0xff]  }
  0x53   :  { %358 = vmatpush1.bf16.msra.mxu1 %v820_v27  ;;  %706 = vmatprep.subr.bf16.mxu0 %v821_v29 }
  0x54   :  { %757 = vmatprep.subr.bf16.mxu1 %v965_v0 }
  0x55   :  { %754 = vmatmul.mubr.bf16.vlgmr.msra.gmra.mxu0 %v143_v22 }
  0x56   :  { %707 = vmatpush3.bf16.msra.mxu0 %v822_v30 }
  0x57   :  { %708 = vmatprep.subr.bf16.mxu0 %v823_v31 }
  0x5a   :  { %709 = vmatpush3.bf16.msra.mxu0 %v824_v32 }
  0x5b   :  { %710 = vmatprep.subr.bf16.mxu0 %v825_v33  ;;  %v140_v33 = vld [vmem:[#allocation8 + $0x3] ss:$0 sm:$0xff] }
  0x5e   :  { %711 = vmatpush3.bf16.msra.mxu0 %v826_v34 }
  0x5f   :  { %712 = vmatprep.subr.bf16.mxu0 %v827_v35 }
  0x62   :  { %713 = vmatpush3.bf16.msra.mxu0 %v828_v36 }
  0x63   :  { %714 = vmatprep.subr.bf16.mxu0 %v829_v37 }
  0x66   :  { %715 = vmatpush3.bf16.msra.mxu0 %v830_v38 }
  0x67   :  { %716 = vmatprep.subr.bf16.mxu0 %v831_v49 }
  0x6a   :  { %717 = vmatpush3.bf16.msra.mxu0 %v832_v50 }
  0x6b   :  { %718 = vmatprep.subr.bf16.mxu0 %v833_v51 }
  0x6e   :  { %719 = vmatpush3.bf16.msra.mxu0 %v834_v52 }
  0x6f   :  { %720 = vmatprep.subr.bf16.mxu0 %v835_v53 }
  0x72   :  { %721 = vmatpush3.bf16.msra.mxu0 %v836_v54 }
 0x115   :  { %v226_v40 = vpop.f32.mrf.mxu0 }
 0x116   :  { %v227_v42 = vadd.f32 %v226_v40, %v136_v39 }
 0x117   :  { %v755_v41 = vpop.f32.mrf.mxu0 }
 0x118   :  { %v233_v46 = vmax.f32 %v227_v42, 0.0 }
 0x119   :  { %v229_v43 = vpop.f32.mrf.mxu0 }
 0x11a   :  { %v230_v44 = vadd.f32 %v229_v43, %v136_v39  ;;  %v622_v39 = vand.u32 127, %v253_v59 }
 0x11b   :  { %v756_v45 = vpop.f32.mrf.mxu0 }
 0x11c   :  { %v234_v47 = vmax.f32 %v230_v44, 0.0  ;;  %vm623_vm1 = vcmp.lt.s32.totalorder %v622_v39, 3 }
 0x11e   :  { %v235_v48 = vpack.c.bf16 %v234_v47, %v233_v46 }
 0x120   :  { %376 = vmatmul.mubr.bf16.vlgmr.msra.gmra.mxu1 %v235_v48 }
 0x121   :  { %773 = vmatprep.mubr.msk.bf16.mxu1 %vm966_vm0, %v965_v0  ;;  %758 = vmatpush3.bf16.msra.mxu1 %v837_v55 }
 0x122   :  { %759 = vmatprep.subr.bf16.mxu1 %v965_v0 }
 0x125   :  { %760 = vmatpush3.bf16.msra.mxu1 %v838_v56 }
 0x126   :  { %761 = vmatprep.subr.bf16.mxu1 %v965_v0 }
 0x129   :  { %762 = vmatpush3.bf16.msra.mxu1 %v839_v57 }
 0x12a   :  { %763 = vmatprep.subr.bf16.mxu1 %v965_v0 }
 0x12d   :  { %764 = vmatpush3.bf16.msra.mxu1 %v840_v58 }
 0x12e   :  { %765 = vmatprep.subr.bf16.mxu1 %v965_v0 }
 0x131   :  { %766 = vmatpush3.bf16.msra.mxu1 %v841_v17 }
 0x132   :  { %767 = vmatprep.subr.bf16.mxu1 %v965_v0 }
 0x135   :  { %768 = vmatpush3.bf16.msra.mxu1 %v842_v18 }
 0x136   :  { %769 = vmatprep.subr.bf16.mxu1 %v965_v0 }
 0x139   :  { %770 = vmatpush3.bf16.msra.mxu1 %v843_v19 }
 0x13a   :  { %771 = vmatprep.subr.bf16.mxu1 %v965_v0 }
 0x13d   :  { %772 = vmatpush3.bf16.msra.mxu1 %v844_v20 }
 0x1e0   :  { %v377_v1 = vpop.f32.mrf.mxu1 }
 0x1e1   :  { %v378_v8 = vadd.f32 %v377_v1, %v256_v3 }
 0x1e2   :  { %v379_v4 = vpop.f32.mrf.mxu1 }
 0x1e3   :  { %v380_v6 = vadd.f32 %v379_v4, %v260_v2  ;;  %v386_v14 = vmax.f32 %v378_v8, 0.0 }
 0x1e4   :  { %v381_v5 = vpop.f32.mrf.mxu1 }
 0x1e5   :  { %v382_v7 = vadd.f32 %v381_v5, %v256_v3  ;;  %v387_v12 = vmax.f32 %v380_v6, 0.0 }
 0x1e6   :  { %v383_v9 = vpop.f32.mrf.mxu1 }
 0x1e7   :  { %v384_v10 = vadd.f32 %v383_v9, %v260_v2  ;;  %v388_v11 = vmax.f32 %v382_v7, 0.0 }
 0x1e9   :  { %v389_v13 = vmax.f32 %v384_v10, 0.0  ;;  %v390_v16 = vpack.c.bf16 %v388_v11, %v386_v14 }
 0x1eb   :  { %v391_v15 = vpack.c.bf16 %v389_v13, %v387_v12 }
 0x1ed   :  { %520 = vmatprep.mubr.bf16.mxu0 %v391_v15 }
 0x1ee   :  { %521 = vmatmul.mubr.bf16.vlgmr.msra.gmra.mxu0 %v390_v16 }
 0x2ae   :  { %v722_v21 = vpop.f32.mrf.mxu0 }
 0x2b0   :  { %v723_v22 = vpop.f32.mrf.mxu0 }
 0x2b1   :  { %v724_v23 = vadd.f32 %v723_v22, %v722_v21 }
 0x2b2   :  { %v725_v25 = vpop.f32.mrf.mxu0 }
 0x2b3   :  { %v523_v27 = vadd.f32 %v724_v23, %v139_v24 }
 0x2b4   :  { %v726_v26 = vpop.f32.mrf.mxu0 }
 0x2b5   :  { %v727_v28 = vadd.f32 %v726_v26, %v725_v25  ;;  %v529_v30 = vmax.f32 %v523_v27, 0.0 }
 0x2b7   :  { %v526_v29 = vadd.f32 %v727_v28, %v139_v24 }
 0x2b9   :  { %v530_v31 = vmax.f32 %v526_v29, 0.0 }
 0x2bb   :  { %v531_v32 = vpack.c.bf16 %v530_v31, %v529_v30 }
 0x2bd   :  { %774 = vmatmul.mubr.bf16.vlgmr.msra.gmra.mxu1 %v531_v32 }
 0x37d   :  { %v614_v34 = vpop.f32.mrf.mxu1 }
 0x37e   :  { %v615_v35 = vadd.f32 %v614_v34, %v140_v33 }
 0x37f   :  { %v775_v36 = vpop.f32.mrf.mxu1 }
 0x380   :  { %845 = vtanh.f32 %v615_v35 }
 0x381   :  { %v617_v0 = vpop.f32.mrf.mxu1 }
 0x382   :  { %v618_v37 = vadd.f32 %v617_v0, %v140_v33 }
 0x383   :  { %v776_v38 = vpop.f32.mrf.mxu1 }
 0x384   :  { %847 = vtanh.f32 %v618_v37 }
 0x38d   :  { %v846_v40 = vpop.eup %845 }
 0x38e   :  { %v626_v41 = vsel %vm623_vm1, %v846_v40, %v615_v35 }
 0x38f   :  { %628 = vst [vmem:[#allocation10] sm:$0xff] %v626_v41 }
 0x391   :  { %v848_v42 = vpop.eup %847 }
 0x392   :  { %v627_v43 = vsel %vm623_vm1, %v848_v42, %v618_v37 }
 0x393   :  { %629 = vst [vmem:[#allocation10 + $0x8] sm:$0xff] %v627_v43 }
 0x394   :  { %940 = shalt.err (!%p937_p10)
}
 0x395   :  { %641 = dma.vmem_to_hbm [thread:$0]  %s636_s3, 256, %s1042_s4, [#allocation4], %s959_s20, %s959_s20, %s960_s21  }
 0x396   :  { %955 = dma.done.wait [#allocation4], 256  }
 0x397   :  { %956 = vsyncadd [#allocation4], 4294967040 }
 0x398   :  { %645 = vsyncpa [#allocation3], 1 }
 0x399   :  { %646 = vsyncpa [#allocation6], 1 }
 0x39a   :  { %647 = vsyncpa [#allocation9], 1 }
 0x39b   :  { %648 = vsyncpa [#allocation4], 1 }

</bundles_post_ra>
